<compile_context>
chip_gen: v5e
topology: v5e:2x2
jax: 0.10.0
libtpu: 0.0.40
codegen_flags: <defaults>
</compile_context>

<pallas_src>
import jax
import jax.numpy as jnp
from jax.experimental import pallas as pl
from jax.experimental.pallas import tpu as pltpu

NUM_REG = 70
NUM_EXT = 30
NUM_HEAD = NUM_REG + NUM_EXT        # 100
NUM_HEAD_PAD = 128                  # lane-dense, zero-padded fused-head width


def jstnet_kernel(x_ref, w1t_ref, b1_ref, pool_ref, wht_ref, bh_ref, out_ref):
    """One grid step = bm whole images, all matmuls fused.

    x_ref   : (C, bm*HW)    merged batch*spatial activations (lane-dense N dim)
    w1t_ref : (F, C)        channel-mix weight, pre-transposed     [VMEM-resident]
    b1_ref  : (F, 1)        channel-mix bias (column, f32)         [VMEM-resident]
    pool_ref: (bm*HW, bm)   block-diagonal 1/HW -> segmented mean  [VMEM-resident]
    wht_ref : (128, F)      fused [regular|extra] head weight^T,
                            zero-padded rows 100..127              [VMEM-resident]
    bh_ref  : (128, 1)      fused head bias (column, zero-padded)  [VMEM-resident]
    out_ref : (bm, 128)     fused head output (lane-dense store)
    """
    # Synthetic backbone: 1x1 conv (channel mix) over ALL bm images at once.
    # f32 accumulation regardless of input dtype (bf16 inputs OK).
    h = jnp.dot(w1t_ref[...], x_ref[...],
                preferred_element_type=jnp.float32)              # (F, bm*HW)
    h = jnp.maximum(h + b1_ref[...], 0.0)                        # bias + ReLU (f32 VPU)

    # Segmented global-average-pool on the MXU (no XLU lane reduce, no reshape
    # of the merged lane dim): block-diagonal ones/HW matrix.
    feats = jnp.dot(h, pool_ref[...],
                    preferred_element_type=jnp.float32)          # (F, bm)

    # Fused regular+extra heads: one matmul, bias, then transpose only the tiny
    # constant-size (128, bm) result for a lane-dense (bm, 128) store.
    out = jnp.dot(wht_ref[...], feats,
                  preferred_element_type=jnp.float32) + bh_ref[...]   # (128, bm)
    out_ref[...] = out.T.astype(out_ref.dtype)                        # (bm, 128)


def _pick_bm(batch, block_b):
    """Largest batch tile <= block_b that divides batch exactly (no x padding)."""
    bm = min(batch, block_b)
    while batch % bm:
        bm -= 1
    return bm


def jstnet_forward(x_nchw, params, *, block_b=8, compute_dtype=jnp.float32):
    """x_nchw: [B, C, H, W]. Returns (output [B, 70], extra_outputs [B, 30]).

    Tuning notes:
      * v7x : pick block_b so nb = B // bm >= 2 (shards the parallel batch axis
              across both TensorCores) and 2 * bm * C * HW * bytes <~ 24-28 MiB.
      * v6e/v5e : single TC — use the largest bm that fits VMEM and raise
              vmem_limit_bytes via pltpu.CompilerParams if needed.
      * Real backbone sizes: pass compute_dtype=jnp.bfloat16 (f32 accumulation is
        preserved inside the kernel); loosen the test tolerances accordingly.
    """
    B, C, H, W = x_nchw.shape
    HW = H * W
    F_FEAT = params["w1"].shape[1]

    bm = _pick_bm(B, block_b)
    nb = B // bm

    # One-time layout pass: NCHW -> (C, B*HW) with the merged dim b-major /
    # hw-minor, so block i of size (C, bm*HW) is exactly images [i*bm, (i+1)*bm).
    # HW (and bm*HW) sits in the lane dim -> dense vregs, big matmul N.
    x2 = jnp.transpose(x_nchw.reshape(B, C, HW), (1, 0, 2)).reshape(C, B * HW)
    x2 = x2.astype(compute_dtype)

    # Tiny one-time weight prep (all grid-invariant, VMEM-resident, single-buffered).
    w1t = params["w1"].T.astype(compute_dtype)                           # (F, C)
    b1c = params["b1"].reshape(F_FEAT, 1).astype(jnp.float32)            # (F, 1)
    # Block-diagonal segmented-mean matrix: rows j*HW..(j+1)*HW-1 -> column j.
    pool = (jnp.kron(jnp.eye(bm, dtype=jnp.float32),
                     jnp.ones((HW, 1), jnp.float32)) / float(HW))        # (bm*HW, bm)
    wh = jnp.concatenate([params["w_reg"], params["w_ext"]], axis=1)     # (F, 100)
    wht = jnp.pad(wh, ((0, 0), (0, NUM_HEAD_PAD - NUM_HEAD))).T          # (128, F)
    wht = wht.astype(jnp.float32)
    bh = jnp.concatenate([params["b_reg"], params["b_ext"]], axis=1)     # (1, 100)
    bhc = jnp.pad(bh, ((0, 0), (0, NUM_HEAD_PAD - NUM_HEAD))).T          # (128, 1)
    bhc = bhc.astype(jnp.float32)

    # Whole-array VMEM residency (no block pipeline => no 2x double-buffering of
    # constants; DMA'd once for the whole grid).
    vmem_const = pl.BlockSpec(memory_space=pltpu.MemorySpace.VMEM)

    fused = pl.pallas_call(
        jstnet_kernel,
        out_shape=jax.ShapeDtypeStruct((B, NUM_HEAD_PAD), jnp.float32),
        grid_spec=pltpu.PrefetchScalarGridSpec(
            num_scalar_prefetch=0,
            grid=(nb,),
            in_specs=[
                # Only x is pipelined/double-buffered across the batch grid.
                pl.BlockSpec((C, bm * HW), lambda i: (0, i)),
                vmem_const,   # w1t
                vmem_const,   # b1
                vmem_const,   # pool
                vmem_const,   # wht (fused heads, transposed)
                vmem_const,   # bh
            ],
            out_specs=pl.BlockSpec((bm, NUM_HEAD_PAD), lambda i: (i, 0)),
        ),
        compiler_params=pltpu.CompilerParams(
            dimension_semantics=("parallel",),
            # vmem_limit_bytes: raise toward 128 MiB on v5e/v6e for large bm;
            # keep headroom under 64 MiB on v7x.
        ),
    )(x2, w1t, b1c, pool, wht, bhc)

    output = fused[:, :NUM_REG]
    extra = fused[:, NUM_REG:NUM_HEAD]
    return output, extra


def init_params(key, C, F_FEAT):
    ks = jax.random.split(key, 6)
    scale = 0.05
    return {
        "w1":    scale * jax.random.normal(ks[0], (C, F_FEAT), jnp.float32),
        "b1":    scale * jax.random.normal(ks[1], (1, F_FEAT), jnp.float32),
        "w_reg": scale * jax.random.normal(ks[2], (F_FEAT, NUM_REG), jnp.float32),
        "b_reg": scale * jax.random.normal(ks[3], (1, NUM_REG), jnp.float32),
        "w_ext": scale * jax.random.normal(ks[4], (F_FEAT, NUM_EXT), jnp.float32),
        "b_ext": scale * jax.random.normal(ks[5], (1, NUM_EXT), jnp.float32),
    }


def jstnet_ref(x_nchw, params):
    """Pure-JAX reference for correctness check."""
    B, C, H, W = x_nchw.shape
    x = jnp.transpose(x_nchw, (0, 2, 3, 1)).reshape(B, H * W, C)
    h = jnp.maximum(jnp.einsum("bsc,cf->bsf", x, params["w1"]) + params["b1"], 0.0)
    feat = jnp.mean(h, axis=1)  # (B, F)
    out = feat @ params["w_reg"] + params["b_reg"]
    extra = feat @ params["w_ext"] + params["b_ext"]
    return out, extra


if __name__ == "__main__":
    key = jax.random.PRNGKey(0)
    k_x, k_p = jax.random.split(key)

    B, C, H, W = 2, 4, 16, 16
    F_FEAT = 32

    x = jax.random.normal(k_x, (B, C, H, W), jnp.float32)
    params = init_params(k_p, C, F_FEAT)

    out, extra = jstnet_forward(x, params)
    out, extra = jax.block_until_ready((out, extra))

    ref_out, ref_extra = jstnet_ref(x, params)
    assert out.shape == (B, NUM_REG) and extra.shape == (B, NUM_EXT)
    assert jnp.allclose(out, ref_out, atol=1e-4, rtol=1e-4)
    assert jnp.allclose(extra, ref_extra, atol=1e-4, rtol=1e-4)

    print("KERNEL_OK")
</pallas_src>

<mosaic_0001>
module attributes {stable_mosaic.version = 11 : i64} {
  func.func @jstnet_kernel(%arg0: i32, %arg1: memref<4x512xf32, #tpu.memory_space<vmem>>, %arg2: memref<32x4xf32, #tpu.memory_space<vmem>>, %arg3: memref<32x1xf32, #tpu.memory_space<vmem>>, %arg4: memref<512x2xf32, #tpu.memory_space<vmem>>, %arg5: memref<128x32xf32, #tpu.memory_space<vmem>>, %arg6: memref<128x1xf32, #tpu.memory_space<vmem>>, %arg7: memref<2x128xf32, #tpu.memory_space<vmem>>) attributes {dimension_semantics = [#tpu.dimension_semantics<parallel>], iteration_bounds = array<i64: 1>, scalar_prefetch = 0 : i64, scratch_operands = 0 : i64, tpu.core_type = #tpu.core_type<tc>, window_params = [{transform_indices = @transform_0, window_bounds = array<i64: 4, 512>}, {pipeline_mode = #tpu.pipeline_mode<synchronous>, transform_indices = @transform_1, window_bounds = array<i64: 32, 4>}, {pipeline_mode = #tpu.pipeline_mode<synchronous>, transform_indices = @transform_2, window_bounds = array<i64: 32, 1>}, {pipeline_mode = #tpu.pipeline_mode<synchronous>, transform_indices = @transform_3, window_bounds = array<i64: 512, 2>}, {pipeline_mode = #tpu.pipeline_mode<synchronous>, transform_indices = @transform_4, window_bounds = array<i64: 128, 32>}, {pipeline_mode = #tpu.pipeline_mode<synchronous>, transform_indices = @transform_5, window_bounds = array<i64: 128, 1>}, {transform_indices = @transform_6, window_bounds = array<i64: 2, 128>}]} {
    %c0 = arith.constant 0 : index
    %c0_0 = arith.constant 0 : index
    %0 = vector.load %arg2[%c0, %c0_0] : memref<32x4xf32, #tpu.memory_space<vmem>>, vector<32x4xf32>
    %c0_1 = arith.constant 0 : index
    %c0_2 = arith.constant 0 : index
    %1 = vector.load %arg1[%c0_1, %c0_2] : memref<4x512xf32, #tpu.memory_space<vmem>>, vector<4x512xf32>
    %cst = arith.constant dense<0.000000e+00> : vector<32x512xf32>
    %2 = tpu.matmul %0, %1, %cst {dimension_numbers = #tpu.dot_dimension_numbers<[1], [0], [0], [1], [0, 0, 1, 1], [], []>} : vector<32x4xf32>, vector<4x512xf32>, vector<32x512xf32> -> vector<32x512xf32>
    %c0_3 = arith.constant 0 : index
    %c0_4 = arith.constant 0 : index
    %3 = vector.load %arg3[%c0_3, %c0_4] : memref<32x1xf32, #tpu.memory_space<vmem>>, vector<32x1xf32>
    %4 = vector.broadcast %3 : vector<32x1xf32> to vector<32x512xf32>
    %5 = arith.addf %2, %4 : vector<32x512xf32>
    %cst_5 = arith.constant 0.000000e+00 : f32
    %6 = vector.broadcast %cst_5 : f32 to vector<32x512xf32>
    %7 = arith.maximumf %5, %6 : vector<32x512xf32>
    %c0_6 = arith.constant 0 : index
    %c0_7 = arith.constant 0 : index
    %8 = vector.load %arg4[%c0_6, %c0_7] : memref<512x2xf32, #tpu.memory_space<vmem>>, vector<512x2xf32>
    %cst_8 = arith.constant dense<0.000000e+00> : vector<32x2xf32>
    %9 = tpu.matmul %7, %8, %cst_8 {dimension_numbers = #tpu.dot_dimension_numbers<[1], [0], [0], [1], [0, 0, 1, 1], [], []>} : vector<32x512xf32>, vector<512x2xf32>, vector<32x2xf32> -> vector<32x2xf32>
    %c0_9 = arith.constant 0 : index
    %c0_10 = arith.constant 0 : index
    %10 = vector.load %arg5[%c0_9, %c0_10] : memref<128x32xf32, #tpu.memory_space<vmem>>, vector<128x32xf32>
    %cst_11 = arith.constant dense<0.000000e+00> : vector<128x2xf32>
    %11 = tpu.matmul %10, %9, %cst_11 {dimension_numbers = #tpu.dot_dimension_numbers<[1], [0], [0], [1], [0, 0, 1, 1], [], []>} : vector<128x32xf32>, vector<32x2xf32>, vector<128x2xf32> -> vector<128x2xf32>
    %c0_12 = arith.constant 0 : index
    %c0_13 = arith.constant 0 : index
    %12 = vector.load %arg6[%c0_12, %c0_13] : memref<128x1xf32, #tpu.memory_space<vmem>>, vector<128x1xf32>
    %13 = vector.broadcast %12 : vector<128x1xf32> to vector<128x2xf32>
    %14 = arith.addf %11, %13 : vector<128x2xf32>
    %15 = tpu.transpose %14, [1, 0] : vector<128x2xf32> -> vector<2x128xf32>
    %c0_14 = arith.constant 0 : index
    %c0_15 = arith.constant 0 : index
    %16 = vector.load %arg7[%c0_14, %c0_15] : memref<2x128xf32, #tpu.memory_space<vmem>>, vector<2x128xf32>
    tpu.vector_store %arg7[%c0_14, %c0_15], %15 {strides = array<i32>} : memref<2x128xf32, #tpu.memory_space<vmem>>, vector<2x128xf32>,
    return
  }
  func.func @transform_0(%arg0: i32) -> (i32, i32) {
    %c0_i32 = arith.constant 0 : i32
    %c0_i32_0 = arith.constant 0 : i32
    return %c0_i32, %arg0 : i32, i32
  }
  func.func @transform_1(%arg0: i32) -> (i32, i32) {
    %c0_i32 = arith.constant 0 : i32
    %c0_i32_0 = arith.constant 0 : i32
    %c0_i32_1 = arith.constant 0 : i32
    return %c0_i32, %c0_i32_0 : i32, i32
  }
  func.func @transform_2(%arg0: i32) -> (i32, i32) {
    %c0_i32 = arith.constant 0 : i32
    %c0_i32_0 = arith.constant 0 : i32
    %c0_i32_1 = arith.constant 0 : i32
    return %c0_i32, %c0_i32_0 : i32, i32
  }
  func.func @transform_3(%arg0: i32) -> (i32, i32) {
    %c0_i32 = arith.constant 0 : i32
    %c0_i32_0 = arith.constant 0 : i32
    %c0_i32_1 = arith.constant 0 : i32
    return %c0_i32, %c0_i32_0 : i32, i32
  }
  func.func @transform_4(%arg0: i32) -> (i32, i32) {
    %c0_i32 = arith.constant 0 : i32
    %c0_i32_0 = arith.constant 0 : i32
    %c0_i32_1 = arith.constant 0 : i32
    return %c0_i32, %c0_i32_0 : i32, i32
  }
  func.func @transform_5(%arg0: i32) -> (i32, i32) {
    %c0_i32 = arith.constant 0 : i32
    %c0_i32_0 = arith.constant 0 : i32
    %c0_i32_1 = arith.constant 0 : i32
    return %c0_i32, %c0_i32_0 : i32, i32
  }
  func.func @transform_6(%arg0: i32) -> (i32, i32) {
    %c0_i32 = arith.constant 0 : i32
    %c0_i32_0 = arith.constant 0 : i32
    return %arg0, %c0_i32 : i32, i32
  }
}

</mosaic_0001>

<bundles_post_ra>
// kernel: tpu_custom_call.1
= control target key start
LH: loop header
LB: loop body
LE: loop exit
PB: predicated region body
PF: predicated region fallthrough
CT: control target
= control target key end

     0   :  { %v743_v3 = vmov 0   ;;  %s1139_s0 = inlined_call_operand.vmem [shape: f32[4,512], index: 0, kind: input, shape index: {}]   ;;  %s1140_s1 = inlined_call_operand.vmem [shape: f32[32,4], index: 1, kind: input, shape index: {}]   ;;  %s1141_s2 = inlined_call_operand.vmem [shape: f32[32,1], index: 2, kind: input, shape index: {}]   ;;  %s1142_s3 = inlined_call_operand.vmem [shape: f32[512,2], index: 3, kind: input, shape index: {}]   ;;  %s1143_s4 = inlined_call_operand.vmem [shape: f32[128,32], index: 4, kind: input, shape index: {}]   ;;  %s1144_s5 = inlined_call_operand.vmem [shape: f32[128,1], index: 5, kind: input, shape index: {}]   ;;  %s1145_s6 = inlined_call_operand.hbm [shape: f32[2,128], index: 6, kind: output, shape index: {}]  }
   0x1   :  { %v32_v0 = vld [vmem:[%s1141_s2 + $0x10] sm:$0xff]  ;;  %v30_v1 = vld [vmem:[%s1141_s2] sm:$0xff]  ;;  %715 = vset.pattern.permute.xlu1 %v743_v3  ;;  %714 = vset.pattern.permute.xlu0 %v743_v3  ;;  %v29_v4 = vld [vmem:[%s1139_s0 + $0x8] sm:$0xff] }
   0x2   :  { %v28_v2 = vld [vmem:[%s1139_s0] sm:$0xff]  ;;  %46 = vperm.xlu1 %715, %v32_v0   ;;  %36 = vperm.xlu0 %714, %v30_v1   ;;  %58 = vst [vmem:[#allocation1 + $0x10] ss:$2 sm:$0xff] %v29_v4 }
   0x3   :  { %56 = vst [vmem:[#allocation1] ss:$2 sm:$0xff] %v28_v2  ;;  %716 = vset.pattern.permute.xlu2 %v743_v3 }
   0x4   :  { %11 = vsyncpa [#allocation3], 0  ;;  %vm76_vm0 = vcmask 1043456   ;;  %v33_v5 = vld [vmem:[%s1141_s2 + $0x18] sm:$0xff]  ;;  %v31_v6 = vld [vmem:[%s1141_s2 + $0x8] sm:$0xff]  ;;  %vm63_vm1 = vcmask 31744  }
   0x5   :  { %v24_v7 = vld [vmem:[%s1140_s1] sm:$0xff]  ;;  %v416_v12 = vld [vmem:[%s1144_s5 + $0x18] sm:$0xff]  ;;  %v415_v13 = vld [vmem:[%s1144_s5 + $0x10] sm:$0xff]  ;;  %vm509_vm2 = vcmask 261120   ;;  %s663_s18 = sshll.u32 %s1145_s6, 4  ;;  %s664_s18 = int_to_ptr.hbm [resolvable:$true] %s663_s18 }
   0x6   :  { %v25_v14 = vld [vmem:[%s1140_s1 + $0x8] sm:$0xff]  ;;  %v232_v15 = vld [vmem:[%s1142_s3 + $0x78] sm:$0xff]  ;;  %v231_v17 = vld [vmem:[%s1142_s3 + $0x70] sm:$0xff] }
   0x7   :  { %v264_v16 = vld [vmem:[%s1142_s3 + $0x178] sm:$0xff]  ;;  %v230_v18 = vld [vmem:[%s1142_s3 + $0x68] sm:$0xff]  ;;  %v419_v19 = vld [vmem:[%s1144_s5 + $0x30] sm:$0xff] }
   0x8   :  { %v418_v20 = vld [vmem:[%s1144_s5 + $0x28] sm:$0xff]  ;;  %v26_v21 = vld [vmem:[%s1140_s1 + $0x10] sm:$0xff]  ;;  %v229_v22 = vld [vmem:[%s1142_s3 + $0x60] sm:$0xff] }
   0x9   :  { %v61_v10 = vld.sshfl [vmem:[#allocation1 + $0x10] sm:$0xff pattern:$0x75316420]  ;;  %v62_v11 = vld.sshfl [vmem:[#allocation1 + $0x18] sm:$0xff pattern:$0x75316420] }
   0xa   :  { %v59_v8 = vld.sshfl [vmem:[#allocation1] sm:$0xff pattern:$0x75316420]  ;;  %v60_v9 = vld.sshfl [vmem:[#allocation1 + $0x8] sm:$0xff pattern:$0x75316420]  ;;  %682 = vmatpush.msk.msra.mxu2 %vm76_vm0, %v61_v10  ;;  %687 = vmatpush.msk.msra.mxu3 %vm76_vm0, %v62_v11 }
   0xb   :  { %672 = vmatpush.msk.msra.mxu0 %vm76_vm0, %v59_v8  ;;  %677 = vmatpush.msk.msra.mxu1 %vm76_vm0, %v60_v9  ;;  %v422_v23 = vld [vmem:[%s1144_s5 + $0x48] sm:$0xff]  ;;  %v421_v24 = vld [vmem:[%s1144_s5 + $0x40] sm:$0xff]  ;;  %v27_v25 = vld [vmem:[%s1140_s1 + $0x18] sm:$0xff] }
   0xc   :  { %51 = vperm.xlu1 %715, %v33_v5   ;;  %41 = vperm.xlu0 %714, %v31_v6   ;;  %v425_v26 = vld [vmem:[%s1144_s5 + $0x60] sm:$0xff]  ;;  %v424_v27 = vld [vmem:[%s1144_s5 + $0x58] sm:$0xff]  ;;  %v427_v29 = vld [vmem:[%s1144_s5 + $0x70] sm:$0xff] }
   0xd   :  { %673 = vmatmul.msk.f32.vlgmr.msra.gmra.mxu0 %vm63_vm1, %v24_v7  ;;  %678 = vmatmul.msk.f32.vlgmr.msra.gmra.mxu1 %vm63_vm1, %v24_v7  ;;  %v428_v28 = vld [vmem:[%s1144_s5 + $0x78] sm:$0xff]  ;;  %v263_v31 = vld [vmem:[%s1142_s3 + $0x170] sm:$0xff]  ;;  %v262_v33 = vld [vmem:[%s1142_s3 + $0x168] sm:$0xff] }
   0xe   :  { %683 = vmatmul.msk.f32.vlgmr.msra.gmra.mxu2 %vm63_vm1, %v24_v7  ;;  %688 = vmatmul.msk.f32.vlgmr.msra.gmra.mxu3 %vm63_vm1, %v24_v7  ;;  %v228_v30 = vld [vmem:[%s1142_s3 + $0x58] sm:$0xff]  ;;  %v227_v32 = vld [vmem:[%s1142_s3 + $0x50] sm:$0xff]  ;;  %v226_v34 = vld [vmem:[%s1142_s3 + $0x48] sm:$0xff] }
   0xf   :  { %281 = vmatpush.msrb.mxu1 %v232_v15  ;;  %339 = vmatpush.msrb.mxu3 %v264_v16  ;;  %v261_v35 = vld [vmem:[%s1142_s3 + $0x160] sm:$0xff]  ;;  %v260_v37 = vld [vmem:[%s1142_s3 + $0x158] sm:$0xff]  ;;  %v259_v39 = vld [vmem:[%s1142_s3 + $0x150] sm:$0xff] }
  0x10   :  { %v225_v36 = vld [vmem:[%s1142_s3 + $0x40] sm:$0xff]  ;;  %v224_v38 = vld [vmem:[%s1142_s3 + $0x38] sm:$0xff]  ;;  %v223_v40 = vld [vmem:[%s1142_s3 + $0x30] sm:$0xff] }
  0x11   :  { %282 = vmatpush.msrb.mxu1 %v231_v17  ;;  %340 = vmatpush.msrb.mxu3 %v263_v31  ;;  %v258_v41 = vld [vmem:[%s1142_s3 + $0x148] sm:$0xff]  ;;  %v257_v43 = vld [vmem:[%s1142_s3 + $0x140] sm:$0xff]  ;;  %v256_v45 = vld [vmem:[%s1142_s3 + $0x138] sm:$0xff] }
  0x12   :  { %v222_v42 = vld [vmem:[%s1142_s3 + $0x28] sm:$0xff]  ;;  %v221_v44 = vld [vmem:[%s1142_s3 + $0x20] sm:$0xff]  ;;  %v220_v46 = vld [vmem:[%s1142_s3 + $0x18] sm:$0xff] }
  0x13   :  { %283 = vmatpush.msrb.mxu1 %v230_v18  ;;  %341 = vmatpush.msrb.mxu3 %v262_v33  ;;  %v255_v47 = vld [vmem:[%s1142_s3 + $0x130] sm:$0xff]  ;;  %v254_v49 = vld [vmem:[%s1142_s3 + $0x128] sm:$0xff]  ;;  %v253_v51 = vld [vmem:[%s1142_s3 + $0x120] sm:$0xff] }
  0x14   :  { %446 = vperm.xlu1 %715, %v416_v12   ;;  %441 = vperm.xlu0 %714, %v415_v13   ;;  %v219_v48 = vld [vmem:[%s1142_s3 + $0x10] sm:$0xff]  ;;  %v218_v50 = vld [vmem:[%s1142_s3 + $0x8] sm:$0xff]  ;;  %v217_v52 = vld [vmem:[%s1142_s3] sm:$0xff] }
  0x15   :  { %674 = vmatmul.msk.f32.gmra.mxu0 %vm63_vm1, %v25_v14  ;;  %679 = vmatmul.msk.f32.gmra.mxu1 %vm63_vm1, %v25_v14  ;;  %v252_v53 = vld [vmem:[%s1142_s3 + $0x118] sm:$0xff]  ;;  %v251_v55 = vld [vmem:[%s1142_s3 + $0x110] sm:$0xff]  ;;  %v250_v57 = vld [vmem:[%s1142_s3 + $0x108] sm:$0xff] }
  0x16   :  { %684 = vmatmul.msk.f32.gmra.mxu2 %vm63_vm1, %v25_v14  ;;  %689 = vmatmul.msk.f32.gmra.mxu3 %vm63_vm1, %v25_v14  ;;  %v248_v54 = vld [vmem:[%s1142_s3 + $0xf8] sm:$0xff]  ;;  %v247_v56 = vld [vmem:[%s1142_s3 + $0xf0] sm:$0xff]  ;;  %v246_v58 = vld [vmem:[%s1142_s3 + $0xe8] sm:$0xff] }
  0x17   :  { %284 = vmatpush.msrb.mxu1 %v229_v22  ;;  %342 = vmatpush.msrb.mxu3 %v261_v35  ;;  %v249_v59 = vld [vmem:[%s1142_s3 + $0x100] sm:$0xff]  ;;  %v280_v61 = vld [vmem:[%s1142_s3 + $0x1f8] sm:$0xff]  ;;  %v279_v63 = vld [vmem:[%s1142_s3 + $0x1f0] sm:$0xff] }
  0x18   :  { %v245_v60 = vld [vmem:[%s1142_s3 + $0xe0] sm:$0xff]  ;;  %v244_v62 = vld [vmem:[%s1142_s3 + $0xd8] sm:$0xff]  ;;  %v243_v0 = vld [vmem:[%s1142_s3 + $0xd0] sm:$0xff] }
  0x19   :  { %285 = vmatpush.msrb.mxu1 %v228_v30  ;;  %343 = vmatpush.msrb.mxu3 %v260_v37  ;;  %v278_v1 = vld [vmem:[%s1142_s3 + $0x1e8] sm:$0xff]  ;;  %v277_v3 = vld [vmem:[%s1142_s3 + $0x1e0] sm:$0xff]  ;;  %v276_v5 = vld [vmem:[%s1142_s3 + $0x1d8] sm:$0xff] }
  0x1a   :  { %v242_v2 = vld [vmem:[%s1142_s3 + $0xc8] sm:$0xff]  ;;  %v241_v4 = vld [vmem:[%s1142_s3 + $0xc0] sm:$0xff]  ;;  %v240_v6 = vld [vmem:[%s1142_s3 + $0xb8] sm:$0xff] }
  0x1b   :  { %286 = vmatpush.msrb.mxu1 %v227_v32  ;;  %344 = vmatpush.msrb.mxu3 %v259_v39  ;;  %v275_v7 = vld [vmem:[%s1142_s3 + $0x1d0] sm:$0xff]  ;;  %v274_v9 = vld [vmem:[%s1142_s3 + $0x1c8] sm:$0xff]  ;;  %v273_v11 = vld [vmem:[%s1142_s3 + $0x1c0] sm:$0xff] }
  0x1c   :  { %461 = vperm.xlu1 %715, %v419_v19   ;;  %456 = vperm.xlu0 %714, %v418_v20   ;;  %v239_v8 = vld [vmem:[%s1142_s3 + $0xb0] sm:$0xff]  ;;  %v238_v10 = vld [vmem:[%s1142_s3 + $0xa8] sm:$0xff]  ;;  %v237_v12 = vld [vmem:[%s1142_s3 + $0xa0] sm:$0xff] }
  0x1d   :  { %675 = vmatmul.msk.f32.gmra.mxu0 %vm63_vm1, %v26_v21  ;;  %680 = vmatmul.msk.f32.gmra.mxu1 %vm63_vm1, %v26_v21  ;;  %v272_v13 = vld [vmem:[%s1142_s3 + $0x1b8] sm:$0xff]  ;;  %v271_v16 = vld [vmem:[%s1142_s3 + $0x1b0] sm:$0xff]  ;;  %v270_v19 = vld [vmem:[%s1142_s3 + $0x1a8] sm:$0xff] }
  0x1e   :  { %685 = vmatmul.msk.f32.gmra.mxu2 %vm63_vm1, %v26_v21  ;;  %690 = vmatmul.msk.f32.gmra.mxu3 %vm63_vm1, %v26_v21  ;;  %v236_v15 = vld [vmem:[%s1142_s3 + $0x98] sm:$0xff]  ;;  %v235_v18 = vld [vmem:[%s1142_s3 + $0x90] sm:$0xff]  ;;  %v234_v21 = vld [vmem:[%s1142_s3 + $0x88] sm:$0xff] }
  0x1f   :  { %287 = vmatpush.msrb.mxu1 %v226_v34  ;;  %345 = vmatpush.msrb.mxu3 %v258_v41  ;;  %v269_v22 = vld [vmem:[%s1142_s3 + $0x1a0] sm:$0xff] }
  0x20   :  { %v265_v32 = vld [vmem:[%s1142_s3 + $0x180] sm:$0xff] }
  0x21   :  { %288 = vmatpush.msrb.mxu1 %v225_v36  ;;  %346 = vmatpush.msrb.mxu3 %v257_v43 }
  0x23   :  { %289 = vmatpush.msrb.mxu1 %v224_v38  ;;  %347 = vmatpush.msrb.mxu3 %v256_v45 }
  0x24   :  { %476 = vperm.xlu1 %715, %v422_v23   ;;  %471 = vperm.xlu0 %714, %v421_v24   ;;  %v233_v24 = vld [vmem:[%s1142_s3 + $0x80] sm:$0xff] }
  0x25   :  { %676 = vmatmul.msk.f32.gmra.mxu0 %vm63_vm1, %v27_v25  ;;  %681 = vmatmul.msk.f32.gmra.mxu1 %vm63_vm1, %v27_v25 }
  0x26   :  { %686 = vmatmul.msk.f32.gmra.mxu2 %vm63_vm1, %v27_v25  ;;  %691 = vmatmul.msk.f32.gmra.mxu3 %vm63_vm1, %v27_v25  ;;  %v268_v25 = vld [vmem:[%s1142_s3 + $0x198] sm:$0xff] }
  0x27   :  { %290 = vmatpush.msrb.mxu1 %v223_v40  ;;  %348 = vmatpush.msrb.mxu3 %v255_v47 }
  0x29   :  { %291 = vmatpush.msrb.mxu1 %v222_v42  ;;  %349 = vmatpush.msrb.mxu3 %v254_v49 }
  0x2b   :  { %292 = vmatpush.msrb.mxu1 %v221_v44  ;;  %350 = vmatpush.msrb.mxu3 %v253_v51 }
  0x2c   :  { %491 = vperm.xlu1 %715, %v425_v26   ;;  %486 = vperm.xlu0 %714, %v424_v27   ;;  %v267_v26 = vld [vmem:[%s1142_s3 + $0x190] sm:$0xff]  ;;  %v266_v27 = vld [vmem:[%s1142_s3 + $0x188] sm:$0xff] }
  0x2d   :  { %293 = vmatpush.msrb.mxu1 %v220_v46  ;;  %351 = vmatpush.msrb.mxu3 %v252_v53 }
  0x2f   :  { %294 = vmatpush.msrb.mxu1 %v219_v48  ;;  %352 = vmatpush.msrb.mxu3 %v251_v55 }
  0x31   :  { %295 = vmatpush.msrb.mxu1 %v218_v50  ;;  %353 = vmatpush.msrb.mxu3 %v250_v57 }
  0x33   :  { %296 = vmatpush.msrb.mxu1 %v217_v52  ;;  %354 = vmatpush.msrb.mxu3 %v249_v59 }
  0x34   :  { %506 = vperm.xlu1 %715, %v428_v28   ;;  %501 = vperm.xlu0 %714, %v427_v29  }
  0x35   :  { %310 = vmatpush.msra.mxu1 %v248_v54  ;;  %368 = vmatpush.msra.mxu3 %v280_v61 }
  0x37   :  { %311 = vmatpush.msra.mxu1 %v247_v56  ;;  %369 = vmatpush.msra.mxu3 %v279_v63 }
  0x39   :  { %312 = vmatpush.msra.mxu1 %v246_v58  ;;  %370 = vmatpush.msra.mxu3 %v278_v1 }
  0x3b   :  { %313 = vmatpush.msra.mxu1 %v245_v60  ;;  %371 = vmatpush.msra.mxu3 %v277_v3 }
  0x3d   :  { %314 = vmatpush.msra.mxu1 %v244_v62  ;;  %372 = vmatpush.msra.mxu3 %v276_v5 }
  0x3f   :  { %315 = vmatpush.msra.mxu1 %v243_v0  ;;  %373 = vmatpush.msra.mxu3 %v275_v7 }
  0x41   :  { %316 = vmatpush.msra.mxu1 %v242_v2  ;;  %374 = vmatpush.msra.mxu3 %v274_v9 }
  0x43   :  { %317 = vmatpush.msra.mxu1 %v241_v4  ;;  %375 = vmatpush.msra.mxu3 %v273_v11 }
  0x45   :  { %318 = vmatpush.msra.mxu1 %v240_v6  ;;  %376 = vmatpush.msra.mxu3 %v272_v13 }
  0x47   :  { %319 = vmatpush.msra.mxu1 %v239_v8  ;;  %377 = vmatpush.msra.mxu3 %v271_v16 }
  0x49   :  { %320 = vmatpush.msra.mxu1 %v238_v10  ;;  %378 = vmatpush.msra.mxu3 %v270_v19 }
  0x4b   :  { %321 = vmatpush.msra.mxu1 %v237_v12  ;;  %379 = vmatpush.msra.mxu3 %v269_v22 }
  0x4d   :  { %322 = vmatpush.msra.mxu1 %v236_v15  ;;  %380 = vmatpush.msra.mxu3 %v268_v25  ;;  %v414_v25 = vld [vmem:[%s1144_s5 + $0x8] sm:$0xff] }
  0x4f   :  { %323 = vmatpush.msra.mxu1 %v235_v18  ;;  %381 = vmatpush.msra.mxu3 %v267_v26 }
  0x51   :  { %324 = vmatpush.msra.mxu1 %v234_v21  ;;  %382 = vmatpush.msra.mxu3 %v266_v27 }
  0x53   :  { %325 = vmatpush.msra.mxu1 %v233_v24  ;;  %383 = vmatpush.msra.mxu3 %v265_v32  ;;  %v420_v32 = vld [vmem:[%s1144_s5 + $0x38] sm:$0xff] }
  0x74   :  { %v1015_v14 = vpop.permute.xlu0 %36  ;;  %v47_v36 = vpop.permute.xlu1 %46 }
  0x7e   :  { %v42_v29 = vpop.permute.xlu0 %41  ;;  %v52_v45 = vpop.permute.xlu1 %51 }
  0x8a   :  { %v102_v17 = vpop.f32.mrf.mxu0  ;;  %v131_v43 = vpop.f32.mrf.mxu1 }
  0x8b   :  { %v103_v20 = vadd.f32 %v102_v17, %v1015_v14  ;;  %v132_v52 = vadd.f32 %v131_v43, %v1015_v14 }
  0x8d   :  { %v201_v23 = vmax.f32 %v103_v20, 0.0  ;;  %v202_v57 = vmax.f32 %v132_v52, 0.0  ;;  %v407_v52 = vld [vmem:[%s1143_s4 + $0x50] sm:$0xff] }
  0x8f   :  { %297 = vmatmul.f32.vlgmr.msrb.gmra.mxu1 %v201_v23  ;;  %v413_v23 = vld [vmem:[%s1144_s5] sm:$0xff] }
  0x90   :  { %431 = vperm.xlu2 %716, %v413_v23  }
  0x91   :  { %v160_v28 = vpop.f32.mrf.mxu2  ;;  %v189_v51 = vpop.f32.mrf.mxu3 }
  0x92   :  { %v161_v30 = vadd.f32 %v160_v28, %v1015_v14  ;;  %v105_v31 = vpop.f32.mrf.mxu0  ;;  %v134_v54 = vpop.f32.mrf.mxu1  ;;  %v190_v58 = vadd.f32 %v189_v51, %v1015_v14  ;;  %v417_v28 = vld [vmem:[%s1144_s5 + $0x20] sm:$0xff]  ;;  %v399_v51 = vld [vmem:[%s1143_s4 + $0x10] sm:$0xff] }
  0x93   :  { %v106_v33 = vadd.f32 %v105_v31, %v42_v29  ;;  %v135_v59 = vadd.f32 %v134_v54, %v42_v29  ;;  %v408_v54 = vld [vmem:[%s1143_s4 + $0x58] sm:$0xff] }
  0x94   :  { %v203_v34 = vmax.f32 %v161_v30, 0.0  ;;  %v204_v61 = vmax.f32 %v190_v58, 0.0  ;;  %v410_v58 = vld [vmem:[%s1143_s4 + $0x68] sm:$0xff] }
  0x95   :  { %v205_v35 = vmax.f32 %v106_v33, 0.0  ;;  %v206_v63 = vmax.f32 %v135_v59, 0.0  ;;  %v403_v59 = vld [vmem:[%s1143_s4 + $0x30] sm:$0xff] }
  0x96   :  { %355 = vmatmul.f32.vlgmr.msrb.gmra.mxu3 %v203_v34 }
  0x97   :  { %300 = vmatmul.f32.gmra.mxu1 %v205_v35 }
  0x98   :  { %436 = vperm.xlu2 %716, %v414_v25  }
  0x99   :  { %v163_v37 = vpop.f32.mrf.mxu2  ;;  %v192_v60 = vpop.f32.mrf.mxu3 }
  0x9a   :  { %v164_v38 = vadd.f32 %v163_v37, %v42_v29  ;;  %v108_v39 = vpop.f32.mrf.mxu0  ;;  %v137_v62 = vpop.f32.mrf.mxu1  ;;  %v193_v0 = vadd.f32 %v192_v60, %v42_v29  ;;  %v411_v60 = vld [vmem:[%s1143_s4 + $0x70] sm:$0xff] }
  0x9b   :  { %v109_v40 = vadd.f32 %v108_v39, %v47_v36  ;;  %v138_v1 = vadd.f32 %v137_v62, %v47_v36  ;;  %v412_v62 = vld [vmem:[%s1143_s4 + $0x78] sm:$0xff] }
  0x9c   :  { %v207_v41 = vmax.f32 %v164_v38, 0.0  ;;  %v208_v3 = vmax.f32 %v193_v0, 0.0 }
  0x9d   :  { %v209_v42 = vmax.f32 %v109_v40, 0.0  ;;  %v210_v4 = vmax.f32 %v138_v1, 0.0 }
  0x9e   :  { %358 = vmatmul.f32.gmra.mxu3 %v207_v41 }
  0x9f   :  { %303 = vmatmul.f32.gmra.mxu1 %v209_v42  ;;  %v423_v42 = vld [vmem:[%s1144_s5 + $0x50] sm:$0xff] }
  0xa0   :  { %451 = vperm.xlu2 %716, %v417_v28  }
  0xa1   :  { %v166_v44 = vpop.f32.mrf.mxu2  ;;  %v195_v2 = vpop.f32.mrf.mxu3 }
  0xa2   :  { %v167_v46 = vadd.f32 %v166_v44, %v47_v36  ;;  %v111_v47 = vpop.f32.mrf.mxu0  ;;  %v140_v5 = vpop.f32.mrf.mxu1  ;;  %v196_v6 = vadd.f32 %v195_v2, %v47_v36 }
  0xa3   :  { %v112_v48 = vadd.f32 %v111_v47, %v52_v45  ;;  %v141_v7 = vadd.f32 %v140_v5, %v52_v45  ;;  %v405_v47 = vld [vmem:[%s1143_s4 + $0x40] sm:$0xff]  ;;  %v442_v5 = vpop.permute.xlu0 %441 }
  0xa4   :  { %v211_v49 = vmax.f32 %v167_v46, 0.0  ;;  %v212_v8 = vmax.f32 %v196_v6, 0.0  ;;  %v397_v46 = vld [vmem:[%s1143_s4] sm:$0xff] }
  0xa5   :  { %v213_v50 = vmax.f32 %v112_v48, 0.0  ;;  %v214_v9 = vmax.f32 %v141_v7, 0.0  ;;  %v426_v48 = vld [vmem:[%s1144_s5 + $0x68] sm:$0xff] }
  0xa6   :  { %361 = vmatmul.f32.gmra.mxu3 %v211_v49  ;;  %v398_v49 = vld [vmem:[%s1143_s4 + $0x8] sm:$0xff] }
  0xa7   :  { %306 = vmatmul.f32.gmra.mxu1 %v213_v50  ;;  %v406_v50 = vld [vmem:[%s1143_s4 + $0x48] sm:$0xff] }
  0xa8   :  { %466 = vperm.xlu2 %716, %v420_v32  }
  0xa9   :  { %v169_v53 = vpop.f32.mrf.mxu2  ;;  %v198_v10 = vpop.f32.mrf.mxu3 }
  0xaa   :  { %v170_v55 = vadd.f32 %v169_v53, %v52_v45  ;;  %v199_v11 = vadd.f32 %v198_v10, %v52_v45  ;;  %v400_v53 = vld [vmem:[%s1143_s4 + $0x18] sm:$0xff] }
  0xac   :  { %v215_v56 = vmax.f32 %v170_v55, 0.0  ;;  %v216_v12 = vmax.f32 %v199_v11, 0.0  ;;  %v401_v55 = vld [vmem:[%s1143_s4 + $0x20] sm:$0xff] }
  0xae   :  { %364 = vmatmul.f32.gmra.mxu3 %v215_v56  ;;  %v409_v56 = vld [vmem:[%s1143_s4 + $0x60] sm:$0xff] }
  0xaf   :  { %326 = vmatmul.f32.vlgmr.msra.gmra.mxu1 %v202_v57  ;;  %v402_v57 = vld [vmem:[%s1143_s4 + $0x28] sm:$0xff] }
  0xb0   :  { %481 = vperm.xlu2 %716, %v423_v42  }
  0xb6   :  { %384 = vmatmul.f32.vlgmr.msra.gmra.mxu3 %v204_v61  ;;  %v404_v61 = vld [vmem:[%s1143_s4 + $0x38] sm:$0xff]  ;;  %s744_s4 = smov [#allocation2]  }
  0xb7   :  { %329 = vmatmul.f32.gmra.mxu1 %v206_v63  ;;  %s661_s15 = sshll.u32 %s744_s4, 4  ;;  %s662_s15 = int_to_ptr.vmem [resolvable:$true] %s661_s15 }
  0xb8   :  { %496 = vperm.xlu2 %716, %v426_v48  }
  0xbe   :  { %387 = vmatmul.f32.gmra.mxu3 %v208_v3 }
  0xbf   :  { %332 = vmatmul.f32.gmra.mxu1 %v210_v4 }
  0xc6   :  { %390 = vmatmul.f32.gmra.mxu3 %v212_v8  ;;  %v447_v8 = vpop.permute.xlu1 %446 }
  0xc7   :  { %335 = vmatmul.f32.gmra.mxu1 %v214_v9 }
  0xce   :  { %393 = vmatmul.f32.gmra.mxu3 %v216_v12 }
  0xea   :  { %v432_v63 = vpop.permute.xlu2 %431 }
  0xf2   :  { %v437_v2 = vpop.permute.xlu2 %436 }
  0xfa   :  { %v452_v11 = vpop.permute.xlu2 %451 }
 0x10c   :  { %v298_v13 = vpop.f32.mrf.mxu1 }
 0x114   :  { %v301_v14 = vpop.f32.mrf.mxu1 }
 0x119   :  { %v356_v15 = vpop.f32.mrf.mxu3 }
 0x11c   :  { %v304_v16 = vpop.f32.mrf.mxu1 }
 0x121   :  { %v359_v17 = vpop.f32.mrf.mxu3 }
 0x124   :  { %v307_v18 = vpop.f32.mrf.mxu1 }
 0x129   :  { %v362_v19 = vpop.f32.mrf.mxu3 }
 0x12c   :  { %v327_v20 = vpop.f32.mrf.mxu1 }
 0x12d   :  { %v328_v37 = vadd.f32 %v327_v20, %v298_v13 }
 0x12f   :  { %v357_v43 = vadd.f32 %v356_v15, %v328_v37 }
 0x131   :  { %v365_v21 = vpop.f32.mrf.mxu3 }
 0x134   :  { %v330_v22 = vpop.f32.mrf.mxu1 }
 0x135   :  { %v331_v34 = vadd.f32 %v330_v22, %v301_v14  ;;  %v457_v14 = vpop.permute.xlu0 %456 }
 0x137   :  { %v360_v40 = vadd.f32 %v359_v17, %v331_v34  ;;  %v462_v17 = vpop.permute.xlu1 %461 }
 0x139   :  { %v385_v24 = vpop.f32.mrf.mxu3 }
 0x13a   :  { %v386_v45 = vadd.f32 %v385_v24, %v357_v43 }
 0x13c   :  { %v333_v26 = vpop.f32.mrf.mxu1 }
 0x13d   :  { %v334_v33 = vadd.f32 %v333_v26, %v304_v16  ;;  %v472_v25 = vpop.permute.xlu0 %471 }
 0x13f   :  { %v363_v38 = vadd.f32 %v362_v19, %v334_v33  ;;  %v477_v28 = vpop.permute.xlu1 %476 }
 0x141   :  { %v388_v27 = vpop.f32.mrf.mxu3 }
 0x142   :  { %v389_v44 = vadd.f32 %v388_v27, %v360_v40 }
 0x144   :  { %v336_v29 = vpop.f32.mrf.mxu1 }
 0x145   :  { %v337_v31 = vadd.f32 %v336_v29, %v307_v18  ;;  %v487_v33 = vpop.permute.xlu0 %486 }
 0x147   :  { %v366_v35 = vadd.f32 %v365_v21, %v337_v31  ;;  %v467_v21 = vpop.permute.xlu2 %466 }
 0x149   :  { %v391_v30 = vpop.f32.mrf.mxu3 }
 0x14a   :  { %v392_v41 = vadd.f32 %v391_v30, %v363_v38 }
 0x14d   :  { %v502_v42 = vpop.permute.xlu0 %501 }
 0x14f   :  { %v482_v31 = vpop.permute.xlu2 %481 }
 0x151   :  { %v394_v36 = vpop.f32.mrf.mxu3 }
 0x152   :  { %v395_v39 = vadd.f32 %v394_v36, %v366_v35  ;;  %v492_v36 = vpop.permute.xlu1 %491 }
 0x154   :  { %570 = vmatpush.msrb.mxu0 %v395_v39  ;;  %708 = vmatpush.msrb.mxu2 %v395_v39 }
 0x156   :  { %571 = vmatpush.msrb.mxu0 %v392_v41  ;;  %709 = vmatpush.msrb.mxu2 %v392_v41 }
 0x157   :  { %v497_v39 = vpop.permute.xlu2 %496 }
 0x158   :  { %572 = vmatpush.msrb.mxu0 %v389_v44  ;;  %710 = vmatpush.msrb.mxu2 %v389_v44 }
 0x15a   :  { %573 = vmatpush.msrb.mxu0 %v386_v45  ;;  %711 = vmatpush.msrb.mxu2 %v386_v45  ;;  %v507_v45 = vpop.permute.xlu1 %506 }
 0x15b   :  { %692 = vmatmul.msk.f32.vlgmr.msrb.gmra.mxu0 %vm509_vm2, %v397_v46  ;;  %700 = vmatmul.msk.f32.vlgmr.msrb.gmra.mxu2 %vm509_vm2, %v405_v47 }
 0x163   :  { %693 = vmatmul.msk.f32.gmra.mxu0 %vm509_vm2, %v398_v49  ;;  %701 = vmatmul.msk.f32.gmra.mxu2 %vm509_vm2, %v406_v50 }
 0x16b   :  { %694 = vmatmul.msk.f32.gmra.mxu0 %vm509_vm2, %v399_v51  ;;  %702 = vmatmul.msk.f32.gmra.mxu2 %vm509_vm2, %v407_v52 }
 0x173   :  { %695 = vmatmul.msk.f32.gmra.mxu0 %vm509_vm2, %v400_v53  ;;  %703 = vmatmul.msk.f32.gmra.mxu2 %vm509_vm2, %v408_v54 }
 0x17b   :  { %696 = vmatmul.msk.f32.gmra.mxu0 %vm509_vm2, %v401_v55  ;;  %704 = vmatmul.msk.f32.gmra.mxu2 %vm509_vm2, %v409_v56 }
 0x183   :  { %697 = vmatmul.msk.f32.gmra.mxu0 %vm509_vm2, %v402_v57  ;;  %705 = vmatmul.msk.f32.gmra.mxu2 %vm509_vm2, %v410_v58 }
 0x18b   :  { %698 = vmatmul.msk.f32.gmra.mxu0 %vm509_vm2, %v403_v59  ;;  %706 = vmatmul.msk.f32.gmra.mxu2 %vm509_vm2, %v411_v60 }
 0x193   :  { %699 = vmatmul.msk.f32.gmra.mxu0 %vm509_vm2, %v404_v61  ;;  %707 = vmatmul.msk.f32.gmra.mxu2 %vm509_vm2, %v412_v62 }
 0x1d8   :  { %v575_v0 = vpop.f32.mrf.mxu0 }
 0x1d9   :  { %v576_v1 = vadd.f32 %v575_v0, %v432_v63 }
 0x1db   :  { %623 = vxpose.xlu2.b32.start [1/16] (narrow) %v576_v1, 8 }
 0x1de   :  { %v599_v18 = vpop.f32.mrf.mxu2 }
 0x1df   :  { %v600_v26 = vadd.f32 %v599_v18, %v472_v25 }
 0x1e0   :  { %v578_v3 = vpop.f32.mrf.mxu0 }
 0x1e1   :  { %v579_v4 = vadd.f32 %v578_v3, %v437_v2 }
 0x1e3   :  { %624 = vxpose.xlu2.b32.cont [2/16] (narrow) %v579_v4, 8 }
 0x1e6   :  { %v602_v24 = vpop.f32.mrf.mxu2 }
 0x1e7   :  { %v603_v29 = vadd.f32 %v602_v24, %v477_v28 }
 0x1e8   :  { %v581_v6 = vpop.f32.mrf.mxu0 }
 0x1e9   :  { %v582_v7 = vadd.f32 %v581_v6, %v442_v5 }
 0x1eb   :  { %625 = vxpose.xlu2.b32.cont [3/16] (narrow) %v582_v7, 8 }
 0x1ee   :  { %v605_v27 = vpop.f32.mrf.mxu2 }
 0x1ef   :  { %v606_v32 = vadd.f32 %v605_v27, %v482_v31 }
 0x1f0   :  { %v584_v9 = vpop.f32.mrf.mxu0 }
 0x1f1   :  { %v585_v10 = vadd.f32 %v584_v9, %v447_v8 }
 0x1f3   :  { %626 = vxpose.xlu2.b32.cont [4/16] (narrow) %v585_v10, 8 }
 0x1f6   :  { %v608_v30 = vpop.f32.mrf.mxu2 }
 0x1f7   :  { %v609_v35 = vadd.f32 %v608_v30, %v487_v33 }
 0x1f8   :  { %v587_v12 = vpop.f32.mrf.mxu0 }
 0x1f9   :  { %v588_v13 = vadd.f32 %v587_v12, %v452_v11 }
 0x1fb   :  { %627 = vxpose.xlu2.b32.cont [5/16] (narrow) %v588_v13, 8 }
 0x1fe   :  { %v611_v34 = vpop.f32.mrf.mxu2 }
 0x1ff   :  { %v612_v37 = vadd.f32 %v611_v34, %v492_v36 }
 0x200   :  { %v590_v15 = vpop.f32.mrf.mxu0 }
 0x201   :  { %v591_v16 = vadd.f32 %v590_v15, %v457_v14 }
 0x203   :  { %628 = vxpose.xlu2.b32.cont [6/16] (narrow) %v591_v16, 8 }
 0x206   :  { %v614_v38 = vpop.f32.mrf.mxu2 }
 0x207   :  { %v615_v40 = vadd.f32 %v614_v38, %v497_v39 }
 0x208   :  { %v593_v19 = vpop.f32.mrf.mxu0 }
 0x209   :  { %v594_v20 = vadd.f32 %v593_v19, %v462_v17 }
 0x20b   :  { %629 = vxpose.xlu2.b32.cont [7/16] (narrow) %v594_v20, 8 }
 0x20e   :  { %v617_v41 = vpop.f32.mrf.mxu2 }
 0x20f   :  { %v618_v43 = vadd.f32 %v617_v41, %v502_v42 }
 0x210   :  { %v596_v22 = vpop.f32.mrf.mxu0 }
 0x211   :  { %v597_v23 = vadd.f32 %v596_v22, %v467_v21 }
 0x213   :  { %630 = vxpose.xlu2.b32.cont [8/16] (narrow) %v597_v23, 8 }
 0x216   :  { %v620_v44 = vpop.f32.mrf.mxu2 }
 0x217   :  { %v621_v46 = vadd.f32 %v620_v44, %v507_v45 }
 0x21b   :  { %631 = vxpose.xlu2.b32.cont [9/16] (narrow) %v600_v26, 8 }
 0x223   :  { %632 = vxpose.xlu2.b32.cont [10/16] (narrow) %v603_v29, 8 }
 0x22b   :  { %633 = vxpose.xlu2.b32.cont [11/16] (narrow) %v606_v32, 8 }
 0x233   :  { %634 = vxpose.xlu2.b32.cont [12/16] (narrow) %v609_v35, 8 }
 0x23b   :  { %635 = vxpose.xlu2.b32.cont [13/16] (narrow) %v612_v37, 8 }
 0x243   :  { %636 = vxpose.xlu2.b32.cont [14/16] (narrow) %v615_v40, 8 }
 0x24b   :  { %637 = vxpose.xlu2.b32.cont [15/16] (narrow) %v618_v43, 8 }
 0x253   :  { %638 = vxpose.xlu2.b32.end [16/16] (narrow) %v621_v46, 8 }
 0x274   :  { %v639_v47 = vpop.trf.xlu2 }
 0x275   :  { %655 = vst [vmem:[#allocation2] sm:$0x3] %v639_v47 }
 0x276   :  { %666 = dma.vmem_to_hbm [thread:$0]  %s662_s15, 32, %s664_s18, [#allocation3]  }
 0x277   :  { %741 = dma.done.wait [#allocation3], 32  }
 0x278   :  { %742 = vsyncadd [#allocation3], 4294967264 }
 0x279   :  { %671 = vsyncpa [#allocation3], 1 }

</bundles_post_ra>
